<compile_context>
chip_gen: v5e
topology: v5e:2x2
jax: 0.10.0
libtpu: 0.0.40
codegen_flags: <defaults>
</compile_context>

<pallas_src>
import functools

import jax
import jax.numpy as jnp
from jax import lax
from jax.experimental import pallas as pl
from jax.experimental.pallas import tpu as pltpu


def _attn_kernel(q_ref, k_ref, v_ref, mask_ref, o_ref, *, alpha):
    q = q_ref[...]  # (B, Lq, D)
    k = k_ref[...]  # (B, Lk, D)
    v = v_ref[...]  # (B, Lk, D)

    # Q @ K^T as a batched dot_general contracting on D (no explicit transpose).
    s = lax.dot_general(
        q,
        k,
        dimension_numbers=(((2,), (2,)), ((0,), (0,))),
        preferred_element_type=jnp.float32,
    )  # (B, Lq, Lk)
    if alpha != 1:
        s = s * alpha

    # Numerically stable softmax over the last axis.
    m = jnp.max(s, axis=-1, keepdims=True)
    e = jnp.exp(s - m)
    inv = pl.reciprocal(jnp.sum(e, axis=-1, keepdims=True), approx=True)  # EUP
    p = e * inv

    # Dropout: mask is precomputed and pre-scaled by 1/(1-p) -> one vmul.
    p = p * mask_ref[...]

    # dropout(softmax(qk)) @ V  (batched, contracting on Lk).
    out = lax.dot_general(
        p.astype(v.dtype),
        v,
        dimension_numbers=(((2,), (1,)), ((0,), (0,))),
        preferred_element_type=jnp.float32,
    )  # (B, Lq, D)
    o_ref[...] = out.astype(o_ref.dtype)


def attention(query, key, value, alpha=1.0, p_drop=0.1, *, dropout_rng=None,
              training=True):
    B, Lq, D = query.shape
    _, Lk, _ = key.shape

    # Dropout keep-mask, pre-scaled by 1/(1-p).  Mirrors F.dropout(p=0.1)
    # (training=True by default in the PyTorch functional API).
    if training and p_drop > 0.0:
        if dropout_rng is None:
            dropout_rng = jax.random.PRNGKey(0)
        keep = jax.random.bernoulli(dropout_rng, 1.0 - p_drop, (B, Lq, Lk))
        mask = keep.astype(jnp.float32) * (1.0 / (1.0 - p_drop))
    else:
        mask = jnp.ones((B, Lq, Lk), jnp.float32)

    kernel = functools.partial(_attn_kernel, alpha=float(alpha))

    return pl.pallas_call(
        kernel,
        out_shape=jax.ShapeDtypeStruct((B, Lq, D), query.dtype),
        grid=(1,),  # single step: everything fits in VMEM, no per-batch overhead
        in_specs=[
            pl.BlockSpec((B, Lq, D), lambda i: (0, 0, 0)),
            pl.BlockSpec((B, Lk, D), lambda i: (0, 0, 0)),
            pl.BlockSpec((B, Lk, D), lambda i: (0, 0, 0)),
            pl.BlockSpec((B, Lq, Lk), lambda i: (0, 0, 0)),
        ],
        out_specs=pl.BlockSpec((B, Lq, D), lambda i: (0, 0, 0)),
        compiler_params=pltpu.CompilerParams(
            dimension_semantics=("arbitrary",),
        ),
    )(query, key, value, mask)


if __name__ == "__main__":
    rng = jax.random.PRNGKey(0)
    kq, kk, kv, kd = jax.random.split(rng, 4)
    # Shapes match the PyTorch module's example tensors.
    query = jax.random.normal(kq, (5, 8, 64), dtype=jnp.float32)
    key = jax.random.normal(kk, (5, 6, 64), dtype=jnp.float32)
    value = jax.random.normal(kv, (5, 6, 64), dtype=jnp.float32)

    out = attention(query, key, value, alpha=1.0, p_drop=0.1, dropout_rng=kd)
    jax.block_until_ready(out)
    assert out.shape == (5, 8, 64) and out.dtype == jnp.float32
    print("KERNEL_OK")
</pallas_src>

<mosaic_0001>
module attributes {stable_mosaic.version = 11 : i64} {
  func.func @_attn_kernel(%arg0: i32, %arg1: memref<5x8x64xf32, #tpu.memory_space<vmem>>, %arg2: memref<5x6x64xf32, #tpu.memory_space<vmem>>, %arg3: memref<5x6x64xf32, #tpu.memory_space<vmem>>, %arg4: memref<5x8x6xf32, #tpu.memory_space<vmem>>, %arg5: memref<5x8x64xf32, #tpu.memory_space<vmem>>) attributes {dimension_semantics = [#tpu.dimension_semantics<arbitrary>], iteration_bounds = array<i64: 1>, scalar_prefetch = 0 : i64, scratch_operands = 0 : i64, tpu.core_type = #tpu.core_type<tc>, window_params = [{pipeline_mode = #tpu.pipeline_mode<synchronous>, transform_indices = @transform_0, window_bounds = array<i64: 5, 8, 64>}, {pipeline_mode = #tpu.pipeline_mode<synchronous>, transform_indices = @transform_1, window_bounds = array<i64: 5, 6, 64>}, {pipeline_mode = #tpu.pipeline_mode<synchronous>, transform_indices = @transform_2, window_bounds = array<i64: 5, 6, 64>}, {pipeline_mode = #tpu.pipeline_mode<synchronous>, transform_indices = @transform_3, window_bounds = array<i64: 5, 8, 6>}, {pipeline_mode = #tpu.pipeline_mode<synchronous>, transform_indices = @transform_4, window_bounds = array<i64: 5, 8, 64>}]} {
    %c0 = arith.constant 0 : index
    %c0_0 = arith.constant 0 : index
    %c0_1 = arith.constant 0 : index
    %0 = vector.load %arg1[%c0, %c0_0, %c0_1] : memref<5x8x64xf32, #tpu.memory_space<vmem>>, vector<5x8x64xf32>
    %c0_2 = arith.constant 0 : index
    %c0_3 = arith.constant 0 : index
    %c0_4 = arith.constant 0 : index
    %1 = vector.load %arg2[%c0_2, %c0_3, %c0_4] : memref<5x6x64xf32, #tpu.memory_space<vmem>>, vector<5x6x64xf32>
    %c0_5 = arith.constant 0 : index
    %c0_6 = arith.constant 0 : index
    %c0_7 = arith.constant 0 : index
    %2 = vector.load %arg3[%c0_5, %c0_6, %c0_7] : memref<5x6x64xf32, #tpu.memory_space<vmem>>, vector<5x6x64xf32>
    %cst = arith.constant dense<0.000000e+00> : vector<5x8x6xf32>
    %3 = tpu.matmul %0, %1, %cst {dimension_numbers = #tpu.dot_dimension_numbers<[2], [2], [1], [1], [0, 0, 0, 1, 1, 1], [0], [0]>} : vector<5x8x64xf32>, vector<5x6x64xf32>, vector<5x8x6xf32> -> vector<5x8x6xf32>
    %cst_8 = arith.constant dense<0xFF800000> : vector<5x8xf32>
    %4 = vector.multi_reduction <maximumf>, %3, %cst_8 [2] : vector<5x8x6xf32> to vector<5x8xf32>
    %5 = vector.shape_cast %4 : vector<5x8xf32> to vector<5x8x1xf32>
    %6 = vector.broadcast %5 : vector<5x8x1xf32> to vector<5x8x6xf32>
    %7 = arith.subf %3, %6 : vector<5x8x6xf32>
    %8 = math.exp %7 : vector<5x8x6xf32>
    %cst_9 = arith.constant dense<0.000000e+00> : vector<5x8xf32>
    %9 = vector.multi_reduction <add>, %8, %cst_9 [2] : vector<5x8x6xf32> to vector<5x8xf32>
    %10 = vector.shape_cast %9 : vector<5x8xf32> to vector<5x8x1xf32>
    %11 = tpu.reciprocal %10 {approx = true} : vector<5x8x1xf32> -> vector<5x8x1xf32>
    %12 = vector.broadcast %11 : vector<5x8x1xf32> to vector<5x8x6xf32>
    %13 = arith.mulf %8, %12 : vector<5x8x6xf32>
    %c0_10 = arith.constant 0 : index
    %c0_11 = arith.constant 0 : index
    %c0_12 = arith.constant 0 : index
    %14 = vector.load %arg4[%c0_10, %c0_11, %c0_12] : memref<5x8x6xf32, #tpu.memory_space<vmem>>, vector<5x8x6xf32>
    %15 = arith.mulf %13, %14 : vector<5x8x6xf32>
    %cst_13 = arith.constant dense<0.000000e+00> : vector<5x8x64xf32>
    %16 = tpu.matmul %15, %2, %cst_13 {dimension_numbers = #tpu.dot_dimension_numbers<[2], [1], [1], [2], [0, 0, 0, 1, 1, 2], [0], [0]>} : vector<5x8x6xf32>, vector<5x6x64xf32>, vector<5x8x64xf32> -> vector<5x8x64xf32>
    %c0_14 = arith.constant 0 : index
    %c0_15 = arith.constant 0 : index
    %c0_16 = arith.constant 0 : index
    %17 = vector.load %arg5[%c0_14, %c0_15, %c0_16] : memref<5x8x64xf32, #tpu.memory_space<vmem>>, vector<5x8x64xf32>
    tpu.vector_store %arg5[%c0_14, %c0_15, %c0_16], %16 {strides = array<i32>} : memref<5x8x64xf32, #tpu.memory_space<vmem>>, vector<5x8x64xf32>,
    return
  }
  func.func @transform_0(%arg0: i32) -> (i32, i32, i32) {
    %c0_i32 = arith.constant 0 : i32
    %c0_i32_0 = arith.constant 0 : i32
    %c0_i32_1 = arith.constant 0 : i32
    %c0_i32_2 = arith.constant 0 : i32
    return %c0_i32, %c0_i32_0, %c0_i32_1 : i32, i32, i32
  }
  func.func @transform_1(%arg0: i32) -> (i32, i32, i32) {
    %c0_i32 = arith.constant 0 : i32
    %c0_i32_0 = arith.constant 0 : i32
    %c0_i32_1 = arith.constant 0 : i32
    %c0_i32_2 = arith.constant 0 : i32
    return %c0_i32, %c0_i32_0, %c0_i32_1 : i32, i32, i32
  }
  func.func @transform_2(%arg0: i32) -> (i32, i32, i32) {
    %c0_i32 = arith.constant 0 : i32
    %c0_i32_0 = arith.constant 0 : i32
    %c0_i32_1 = arith.constant 0 : i32
    %c0_i32_2 = arith.constant 0 : i32
    return %c0_i32, %c0_i32_0, %c0_i32_1 : i32, i32, i32
  }
  func.func @transform_3(%arg0: i32) -> (i32, i32, i32) {
    %c0_i32 = arith.constant 0 : i32
    %c0_i32_0 = arith.constant 0 : i32
    %c0_i32_1 = arith.constant 0 : i32
    %c0_i32_2 = arith.constant 0 : i32
    return %c0_i32, %c0_i32_0, %c0_i32_1 : i32, i32, i32
  }
  func.func @transform_4(%arg0: i32) -> (i32, i32, i32) {
    %c0_i32 = arith.constant 0 : i32
    %c0_i32_0 = arith.constant 0 : i32
    %c0_i32_1 = arith.constant 0 : i32
    %c0_i32_2 = arith.constant 0 : i32
    return %c0_i32, %c0_i32_0, %c0_i32_1 : i32, i32, i32
  }
}

</mosaic_0001>

<bundles_post_ra>
// kernel: tpu_custom_call.1
= control target key start
LH: loop header
LB: loop body
LE: loop exit
PB: predicated region body
PF: predicated region fallthrough
CT: control target
= control target key end

     0   :  { %9 = vsyncpa [#allocation3], 0  ;;  %s717_s0 = inlined_call_operand.hbm [shape: f32[5,8,64], index: 0, kind: input, shape index: {}]   ;;  %s718_s1 = inlined_call_operand.hbm [shape: f32[5,6,64], index: 1, kind: input, shape index: {}]   ;;  %s719_s2 = inlined_call_operand.hbm [shape: f32[5,6,64], index: 2, kind: input, shape index: {}]   ;;  %s720_s3 = inlined_call_operand.hbm [shape: f32[5,8,6], index: 3, kind: input, shape index: {}]   ;;  %s721_s4 = inlined_call_operand.hbm [shape: f32[5,8,64], index: 4, kind: output, shape index: {}]  }
   0x1   :  { %10 = vsyncpa [#allocation6], 0 }
   0x2   :  { %11 = vsyncpa [#allocation9], 0 }
   0x3   :  { %12 = vsyncpa [#allocation4], 0  ;;  %s30_s17 = sshll.u32 %s718_s1, 4  ;;  %s625_s18 = smov [#allocation5]   ;;  %s31_s17 = int_to_ptr.hbm [resolvable:$true] %s30_s17 }
   0x4   :  { %s32_s19 = sshll.u32 %s625_s18, 4  ;;  %s17_s22 = sshll.u32 %s717_s0, 4  ;;  %s33_s19 = int_to_ptr.vmem [resolvable:$true] %s32_s19  ;;  %s18_s22 = int_to_ptr.hbm [resolvable:$true] %s17_s22 }
   0x5   :  { %s626_s23 = smov 128   ;;  %s627_s24 = smov 8  }
   0x6   :  { %38 = dma.hbm_to_vmem [thread:$0]  %s31_s17, 640, %s33_s19, [#allocation6], %s626_s23, %s626_s23, %s627_s24  }
   0x7   :  { %s628_s25 = smov [#allocation2]   ;;  %s43_s1 = sshll.u32 %s719_s2, 4  ;;  %s44_s1 = int_to_ptr.hbm [resolvable:$true] %s43_s1 }
   0x8   :  { %s19_s26 = sshll.u32 %s628_s25, 4  ;;  %s56_s30 = sshll.u32 %s720_s3, 4  ;;  %s20_s26 = int_to_ptr.vmem [resolvable:$true] %s19_s26  ;;  %s57_s30 = int_to_ptr.hbm [resolvable:$true] %s56_s30 }
   0x9   :  { %25 = dma.hbm_to_vmem [thread:$0]  %s18_s22, 640, %s20_s26, [#allocation3], %s626_s23, %s626_s23, %s627_s24  }
   0xa   :  { %s629_s5 = smov [#allocation7]   ;;  %s630_s7 = smov [#allocation8]  }
   0xb   :  { %s45_s6 = sshll.u32 %s629_s5, 4  ;;  %s58_s2 = sshll.u32 %s630_s7, 4  ;;  %s46_s6 = int_to_ptr.vmem [resolvable:$true] %s45_s6  ;;  %s59_s2 = int_to_ptr.vmem [resolvable:$true] %s58_s2 }
   0xc   :  { %51 = dma.hbm_to_vmem [thread:$0]  %s44_s1, 640, %s46_s6, [#allocation6], %s626_s23, %s626_s23, %s627_s24  }
   0xd   :  { %64 = dma.hbm_to_vmem [thread:$0]  %s57_s30, 640, %s59_s2, [#allocation9], %s626_s23, %s626_s23, %s627_s24  }
   0xe   :  { %617 = dma.done.wait [#allocation3], 640  }
   0xf   :  { %618 = vsyncadd [#allocation3], 4294966656 }
  0x10   :  { %619 = dma.done.wait [#allocation6], 1280  }
  0x11   :  { %620 = vsyncadd [#allocation6], 4294966016 }
  0x12   :  { %621 = dma.done.wait [#allocation9], 640  }
  0x13   :  { %622 = vsyncadd [#allocation9], 4294966656  ;;  %vm96_vm0 = vcmask 523264   ;;  %v86_v0 = vld [vmem:[#allocation5] sm:$0x3f]  ;;  %v81_v2 = vld [vmem:[#allocation2] sm:$0xff] }
  0x14   :  { %v88_v1 = vld [vmem:[#allocation5 + $0x10] sm:$0x3f]  ;;  %450 = vmatpush.xpose.msk.msra.mxu0 %vm96_vm0, %v86_v0  ;;  %v83_v3 = vld [vmem:[#allocation2 + $0x10] sm:$0xff]  ;;  %v89_v5 = vld [vmem:[#allocation5 + $0x18] sm:$0x3f]  ;;  %vm227_vm1 = vcmask 48128  }
  0x15   :  { %454 = vmatpush.xpose.msk.msra.mxu2 %vm96_vm0, %v88_v1  ;;  %v87_v4 = vld [vmem:[#allocation5 + $0x8] sm:$0x3f]  ;;  %456 = vmatpush.xpose.msk.msra.mxu3 %vm96_vm0, %v89_v5  ;;  %v90_v6 = vld [vmem:[#allocation5 + $0x20] sm:$0x3f]  ;;  %v84_v8 = vld [vmem:[#allocation2 + $0x18] sm:$0xff]  ;;  %vm296_vm2 = vcmask 1045504  }
  0x16   :  { %452 = vmatpush.xpose.msk.msra.mxu1 %vm96_vm0, %v87_v4  ;;  %v82_v7 = vld [vmem:[#allocation2 + $0x8] sm:$0xff]  ;;  %v85_v9 = vld [vmem:[#allocation2 + $0x20] sm:$0xff]  ;;  %v91_v45 = vld [vmem:[#allocation7] sm:$0x3f]  ;;  %s631_s3 = smov [#allocation10]   ;;  %s435_s11 = sshll.u32 %s721_s4, 4  ;;  %s436_s11 = int_to_ptr.hbm [resolvable:$true] %s435_s11 }
  0x17   :  { %451 = vmatmul.msk.f32.vlgmr.msra.gmra.mxu0 %vm96_vm0, %v81_v2  ;;  %v92_v46 = vld [vmem:[#allocation7 + $0x8] sm:$0x3f]  ;;  %v93_v47 = vld [vmem:[#allocation7 + $0x10] sm:$0x3f]  ;;  %v94_v48 = vld [vmem:[#allocation7 + $0x18] sm:$0x3f] }
  0x18   :  { %458 = vmatpush.xpose.msk.msrb.mxu0 %vm96_vm0, %v90_v6  ;;  %455 = vmatmul.msk.f32.vlgmr.msra.gmra.mxu2 %vm96_vm0, %v83_v3  ;;  %v95_v49 = vld [vmem:[#allocation7 + $0x20] sm:$0x3f]  ;;  %v283_v53 = vld [vmem:[#allocation8] sm:$0xff]  ;;  %v285_v58 = vld [vmem:[#allocation8 + $0x10] sm:$0xff]  ;;  %s433_s8 = sshll.u32 %s631_s3, 4  ;;  %s434_s8 = int_to_ptr.vmem [resolvable:$true] %s433_s8 }
  0x19   :  { %453 = vmatmul.msk.f32.vlgmr.msra.gmra.mxu1 %vm96_vm0, %v82_v7  ;;  %457 = vmatmul.msk.f32.vlgmr.msra.gmra.mxu3 %vm96_vm0, %v84_v8  ;;  %v284_v62 = vld [vmem:[#allocation8 + $0x8] sm:$0xff]  ;;  %v286_v4 = vld [vmem:[#allocation8 + $0x18] sm:$0xff]  ;;  %v287_v7 = vld [vmem:[#allocation8 + $0x20] sm:$0xff] }
  0x1a   :  { %460 = vmatpush.msk.msrb.mxu1 %vm296_vm2, %v91_v45  ;;  %462 = vmatpush.msk.msrb.mxu2 %vm296_vm2, %v92_v46 }
  0x1b   :  { %464 = vmatpush.msk.msrb.mxu3 %vm296_vm2, %v93_v47 }
  0x1c   :  { %466 = vmatpush.msk.msra.mxu0 %vm296_vm2, %v94_v48  ;;  %468 = vmatpush.msk.msra.mxu1 %vm296_vm2, %v95_v49 }
  0x1f   :  { %459 = vmatmul.msk.f32.vlgmr.msrb.gmra.mxu0 %vm96_vm0, %v85_v9 }
  0x94   :  { %v120_v10 = vpop.f32.mrf.mxu0 }
  0x95   :  { %v228_v11 = vsel %vm227_vm1, %v120_v10, -inf }
  0x96   :  { %229 = vmax.xlane.f32.xlu0 %v228_v11  ;;  %v146_v12 = vpop.f32.mrf.mxu1 }
  0x97   :  { %v231_v15 = vsel %vm227_vm1, %v146_v12, -inf }
  0x9b   :  { %v172_v13 = vpop.f32.mrf.mxu2 }
  0x9c   :  { %v234_v14 = vsel %vm227_vm1, %v172_v13, -inf  ;;  %v224_v16 = vpop.f32.mrf.mxu0  ;;  %v198_v18 = vpop.f32.mrf.mxu3 }
  0x9d   :  { %235 = vmax.xlane.f32.xlu1 %v234_v14  ;;  %v240_v17 = vsel %vm227_vm1, %v224_v16, -inf  ;;  %v237_v19 = vsel %vm227_vm1, %v198_v18, -inf }
  0x9e   :  { %232 = vmax.xlane.f32.xlu0 %v231_v15  ;;  %241 = vmax.xlane.f32.xlu2 %v240_v17 }
  0xa5   :  { %238 = vmax.xlane.f32.xlu1 %v237_v19 }
 0x109   :  { %v230_v20 = vpop.xlane.xlu0 %229 }
 0x10a   :  { %v243_v21 = vsub.f32 %v120_v10, %v230_v20 }
 0x10c   :  { %v248_v22 = vmul.f32 1.442695, %v243_v21 }
 0x10e   :  { %477 = vpow2.f32 %v248_v22 }
 0x110   :  { %v236_v23 = vpop.xlane.xlu1 %235 }
 0x111   :  { %v245_v24 = vsub.f32 %v172_v13, %v236_v23  ;;  %v233_v25 = vpop.xlane.xlu0 %232  ;;  %v242_v26 = vpop.xlane.xlu2 %241 }
 0x112   :  { %v244_v28 = vsub.f32 %v146_v12, %v233_v25  ;;  %v247_v29 = vsub.f32 %v224_v16, %v242_v26 }
 0x113   :  { %v252_v27 = vmul.f32 1.442695, %v245_v24 }
 0x114   :  { %v478_v30 = vpop.eup %477  ;;  %v250_v31 = vmul.f32 1.442695, %v244_v28  ;;  %v256_v33 = vmul.f32 1.442695, %v247_v29 }
 0x115   :  { %479 = vpow2.f32 %v252_v27  ;;  %v258_v32 = vsel %vm227_vm1, %v478_v30, 0.0 }
 0x116   :  { %481 = vpow2.f32 %v250_v31  ;;  %259 = vadd.xlane.f32.xlu2 %v258_v32 }
 0x117   :  { %483 = vpow2.f32 %v256_v33 }
 0x118   :  { %v239_v34 = vpop.xlane.xlu1 %238 }
 0x119   :  { %v246_v35 = vsub.f32 %v198_v18, %v239_v34 }
 0x11b   :  { %v480_v36 = vpop.eup %479  ;;  %v254_v37 = vmul.f32 1.442695, %v246_v35 }
 0x11c   :  { %v264_v38 = vsel %vm227_vm1, %v480_v36, 0.0  ;;  %v482_v39 = vpop.eup %481 }
 0x11d   :  { %485 = vpow2.f32 %v254_v37  ;;  %265 = vadd.xlane.f32.xlu1 %v264_v38  ;;  %v261_v40 = vsel %vm227_vm1, %v482_v39, 0.0  ;;  %v484_v41 = vpop.eup %483 }
 0x11e   :  { %262 = vadd.xlane.f32.xlu0 %v261_v40  ;;  %v270_v44 = vsel %vm227_vm1, %v484_v41, 0.0 }
 0x123   :  { %v486_v42 = vpop.eup %485 }
 0x124   :  { %v267_v43 = vsel %vm227_vm1, %v486_v42, 0.0 }
 0x125   :  { %268 = vadd.xlane.f32.xlu2 %v267_v43 }
 0x126   :  { %271 = vadd.xlane.f32.xlu0 %v270_v44 }
 0x189   :  { %v260_v50 = vpop.xlane.xlu2 %259 }
 0x18a   :  { %487 = vrcp.f32 %v260_v50 }
 0x190   :  { %v266_v51 = vpop.xlane.xlu1 %265  ;;  %v488_v52 = vpop.eup %487 }
 0x191   :  { %489 = vrcp.f32 %v266_v51  ;;  %v278_v54 = vmul.f32 %v488_v52, %v478_v30  ;;  %v263_v55 = vpop.xlane.xlu0 %262 }
 0x192   :  { %491 = vrcp.f32 %v263_v55 }
 0x193   :  { %v288_v56 = vmul.f32 %v283_v53, %v278_v54 }
 0x195   :  { %461 = vmatmul.msk.f32.vlgmr.msrb.gmra.mxu1 %vm227_vm1, %v288_v56 }
 0x197   :  { %v490_v57 = vpop.eup %489 }
 0x198   :  { %v280_v59 = vmul.f32 %v490_v57, %v480_v36  ;;  %v269_v60 = vpop.xlane.xlu2 %268  ;;  %v492_v61 = vpop.eup %491 }
 0x199   :  { %493 = vrcp.f32 %v269_v60  ;;  %v279_v63 = vmul.f32 %v492_v61, %v482_v39  ;;  %v272_v0 = vpop.xlane.xlu0 %271 }
 0x19a   :  { %v290_v1 = vmul.f32 %v285_v58, %v280_v59  ;;  %495 = vrcp.f32 %v272_v0 }
 0x19b   :  { %v289_v2 = vmul.f32 %v284_v62, %v279_v63 }
 0x19c   :  { %465 = vmatmul.msk.f32.vlgmr.msrb.gmra.mxu3 %vm227_vm1, %v290_v1 }
 0x19d   :  { %463 = vmatmul.msk.f32.vlgmr.msrb.gmra.mxu2 %vm227_vm1, %v289_v2 }
 0x19f   :  { %v494_v3 = vpop.eup %493 }
 0x1a0   :  { %v281_v5 = vmul.f32 %v494_v3, %v486_v42  ;;  %v496_v6 = vpop.eup %495 }
 0x1a1   :  { %v282_v9 = vmul.f32 %v496_v6, %v484_v41 }
 0x1a2   :  { %v291_v8 = vmul.f32 %v286_v4, %v281_v5 }
 0x1a3   :  { %v292_v10 = vmul.f32 %v287_v7, %v282_v9 }
 0x1a4   :  { %467 = vmatmul.msk.f32.vlgmr.msra.gmra.mxu0 %vm227_vm1, %v291_v8 }
 0x1a5   :  { %469 = vmatmul.msk.f32.vlgmr.msra.gmra.mxu1 %vm227_vm1, %v292_v10 }
 0x212   :  { %v317_v11 = vpop.f32.mrf.mxu1 }
 0x213   :  { %424 = vst.msk [vmem:[#allocation10] sm:$0xff] %vm96_vm0, %v317_v11 }
 0x21f   :  { %v369_v12 = vpop.f32.mrf.mxu3 }
 0x220   :  { %426 = vst.msk [vmem:[#allocation10 + $0x10] sm:$0xff] %vm96_vm0, %v369_v12  ;;  %v343_v13 = vpop.f32.mrf.mxu2 }
 0x221   :  { %v395_v14 = vpop.f32.mrf.mxu0  ;;  %425 = vst.msk [vmem:[#allocation10 + $0x8] sm:$0xff] %vm96_vm0, %v343_v13 }
 0x222   :  { %427 = vst.msk [vmem:[#allocation10 + $0x18] sm:$0xff] %vm96_vm0, %v395_v14  ;;  %v421_v15 = vpop.f32.mrf.mxu1 }
 0x223   :  { %428 = vst.msk [vmem:[#allocation10 + $0x20] sm:$0xff] %vm96_vm0, %v421_v15 }
 0x224   :  { %441 = dma.vmem_to_hbm [thread:$0]  %s434_s8, 640, %s436_s11, [#allocation4], %s626_s23, %s626_s23, %s627_s24  }
 0x225   :  { %623 = dma.done.wait [#allocation4], 640  }
 0x226   :  { %624 = vsyncadd [#allocation4], 4294966656 }
 0x227   :  { %446 = vsyncpa [#allocation3], 1 }
 0x228   :  { %447 = vsyncpa [#allocation6], 1 }
 0x229   :  { %448 = vsyncpa [#allocation9], 1 }
 0x22a   :  { %449 = vsyncpa [#allocation4], 1 }

</bundles_post_ra>
